<compile_context>
chip_gen: v7x
topology: tpu7x:2x2x1
jax: 0.10.0
libtpu: 0.0.40
codegen_flags: <defaults>
</compile_context>

<pallas_src>
import jax
import jax.numpy as jnp
from jax.experimental import pallas as pl
from jax.experimental.pallas import tpu as pltpu


def attn_general_kernel(h_ref, enc_ref, w_ref, out_ref):
    # h_ref:   (B, D)     decoder hidden states (hidden[0] in PyTorch layout)
    # enc_ref: (L, B, D)  encoder outputs, native seq-major layout (no HBM transpose)
    # w_ref:   (D, D)     nn.Linear weight (out_features x in_features)
    # out_ref: (B, L)     softmax(energy) over the sequence axis, lane-dense (L on lanes)
    #
    # energy[b, i] = h[b] . (W @ e_{i,b} + bias) = (h[b] @ W) . e_{i,b} + h[b] . bias
    # The bias contribution is constant along i, so it cancels under softmax(dim=i) -> dropped.
    hW = jnp.dot(h_ref[...], w_ref[...],
                 preferred_element_type=jnp.float32)              # (B, D) single small matmul
    # VPU multiply + lane reduce over D; avoids an (L, D) projected intermediate and an
    # N=1 MXU matmul.
    e_lb = jnp.sum(enc_ref[...] * hW[None, :, :], axis=-1)        # (L, B)
    # One tiny XLU transpose of the energies so the softmax and the output store are
    # lane-dense (last dim = L); replaces the wrapper-side transpose of the kernel output.
    e_bl = e_lb.T                                                 # (B, L)
    m = jnp.max(e_bl, axis=-1, keepdims=True)                     # (B, 1)
    p = jnp.exp(e_bl - m)                                         # (B, L)
    denom = jnp.sum(p, axis=-1, keepdims=True)                    # (B, 1)
    # Exact normalization: denom is only (B, 1) elements, the exact divide is free here.
    out_ref[...] = p / denom


def attn_general(hidden, encoder_outputs, W, b=None):
    """'general' Attn forward.

    hidden:          (1, B, D) with D = 2 * hidden_size
    encoder_outputs: (L, B, D) native seq-major layout (PyTorch RNN output)
    W:               (D, D)    nn.Linear weight
    b:               (D,)      nn.Linear bias -- provably a no-op under the softmax
                               (constant over the sequence axis), accepted but unused.
    returns:         (B, 1, L) softmaxed attention weights
    """
    del b  # softmax-invariant: h . bias is constant over the softmax axis
    L, B, D = encoder_outputs.shape
    h = hidden[0]  # (B, D)

    out_bl = pl.pallas_call(
        attn_general_kernel,
        out_shape=jax.ShapeDtypeStruct((B, L), jnp.float32),
        grid=(1,),  # whole (tiny) problem in one step: no per-step pipeline overhead
        in_specs=[
            pl.BlockSpec((B, D), lambda i: (0, 0)),        # hidden states
            pl.BlockSpec((L, B, D), lambda i: (0, 0, 0)),  # encoder outputs (native layout)
            pl.BlockSpec((D, D), lambda i: (0, 0)),        # W
        ],
        out_specs=pl.BlockSpec((B, L), lambda i: (0, 0)),  # lane-dense output block
        compiler_params=pltpu.CompilerParams(
            dimension_semantics=("arbitrary",)),
    )(h, encoder_outputs, W)

    # (B, L) -> (B, 1, L): pure metadata reshape, no transpose / data movement.
    return out_bl[:, None, :]


def attn_general_ref(hidden, encoder_outputs, W, b):
    """Pure-JAX reference mirroring the PyTorch double loop (bias included)."""
    h = hidden[0]                                            # (B, D)
    # energy[b, i] = h[b] . (W @ enc[i, b] + bias)
    we = jnp.einsum("lbd,od->lbo", encoder_outputs, W) + b   # (L, B, D)
    energies = jnp.einsum("bd,lbd->bl", h, we)               # (B, L)
    return jax.nn.softmax(energies, axis=1)[:, None, :]      # (B, 1, L)


if __name__ == "__main__":
    # hidden_size = 32  ->  feature dim D = 2 * hidden_size = 64 ('general' method)
    hidden_size = 32
    D = 2 * hidden_size
    B = 2     # batch
    L = 8     # max_len (encoder sequence length)

    key = jax.random.PRNGKey(0)
    k_h, k_e, k_w, k_b = jax.random.split(key, 4)

    hidden = jax.random.normal(k_h, (1, B, D), dtype=jnp.float32)
    encoder_outputs = jax.random.normal(k_e, (L, B, D), dtype=jnp.float32)

    # nn.Linear(2H, 2H) parameters, deterministic init (uniform like PyTorch default range).
    bound = 1.0 / jnp.sqrt(D)
    W = jax.random.uniform(k_w, (D, D), minval=-bound, maxval=bound, dtype=jnp.float32)
    b = jax.random.uniform(k_b, (D,), minval=-bound, maxval=bound, dtype=jnp.float32)

    out = attn_general(hidden, encoder_outputs, W, b)
    out = jax.block_until_ready(out)

    ref = attn_general_ref(hidden, encoder_outputs, W, b)
    assert out.shape == (B, 1, L)
    # Exact division in the kernel now; remaining deltas are only fp reordering
    # (bias cancellation / hW re-association), so tight tolerances hold.
    assert jnp.allclose(out, ref, atol=1e-5, rtol=1e-5), "mismatch vs reference"
    # Rows must sum to ~1 at f32 precision.
    assert jnp.allclose(jnp.sum(out, axis=-1), 1.0, atol=1e-6)
    # TODO(synk): 'dot' and 'concat' scoring variants not implemented (only 'general').
    print("KERNEL_OK")
</pallas_src>

<mosaic_0001>
module attributes {stable_mosaic.version = 11 : i64} {
  func.func @attn_general_kernel(%arg0: i32, %arg1: memref<2x64xf32, #tpu.memory_space<vmem>>, %arg2: memref<8x2x64xf32, #tpu.memory_space<vmem>>, %arg3: memref<64x64xf32, #tpu.memory_space<vmem>>, %arg4: memref<2x8xf32, #tpu.memory_space<vmem>>) attributes {dimension_semantics = [#tpu.dimension_semantics<arbitrary>], iteration_bounds = array<i64: 1>, scalar_prefetch = 0 : i64, scratch_operands = 0 : i64, tpu.core_type = #tpu.core_type<tc>, window_params = [{pipeline_mode = #tpu.pipeline_mode<synchronous>, transform_indices = @transform_0, window_bounds = array<i64: 2, 64>}, {pipeline_mode = #tpu.pipeline_mode<synchronous>, transform_indices = @transform_1, window_bounds = array<i64: 8, 2, 64>}, {pipeline_mode = #tpu.pipeline_mode<synchronous>, transform_indices = @transform_2, window_bounds = array<i64: 64, 64>}, {pipeline_mode = #tpu.pipeline_mode<synchronous>, transform_indices = @transform_3, window_bounds = array<i64: 2, 8>}]} {
    %c0 = arith.constant 0 : index
    %c0_0 = arith.constant 0 : index
    %0 = vector.load %arg1[%c0, %c0_0] : memref<2x64xf32, #tpu.memory_space<vmem>>, vector<2x64xf32>
    %c0_1 = arith.constant 0 : index
    %c0_2 = arith.constant 0 : index
    %1 = vector.load %arg3[%c0_1, %c0_2] : memref<64x64xf32, #tpu.memory_space<vmem>>, vector<64x64xf32>
    %cst = arith.constant dense<0.000000e+00> : vector<2x64xf32>
    %2 = tpu.matmul %0, %1, %cst {dimension_numbers = #tpu.dot_dimension_numbers<[1], [0], [0], [1], [0, 0, 1, 1], [], []>} : vector<2x64xf32>, vector<64x64xf32>, vector<2x64xf32> -> vector<2x64xf32>
    %c0_3 = arith.constant 0 : index
    %c0_4 = arith.constant 0 : index
    %c0_5 = arith.constant 0 : index
    %3 = vector.load %arg2[%c0_3, %c0_4, %c0_5] : memref<8x2x64xf32, #tpu.memory_space<vmem>>, vector<8x2x64xf32>
    %4 = vector.shape_cast %2 : vector<2x64xf32> to vector<1x2x64xf32>
    %5 = vector.broadcast %4 : vector<1x2x64xf32> to vector<8x2x64xf32>
    %6 = arith.mulf %3, %5 : vector<8x2x64xf32>
    %cst_6 = arith.constant dense<0.000000e+00> : vector<8x2xf32>
    %7 = vector.multi_reduction <add>, %6, %cst_6 [2] : vector<8x2x64xf32> to vector<8x2xf32>
    %8 = tpu.transpose %7, [1, 0] : vector<8x2xf32> -> vector<2x8xf32>
    %cst_7 = arith.constant dense<0xFF800000> : vector<2xf32>
    %9 = vector.multi_reduction <maximumf>, %8, %cst_7 [1] : vector<2x8xf32> to vector<2xf32>
    %10 = vector.shape_cast %9 : vector<2xf32> to vector<2x1xf32>
    %11 = vector.broadcast %10 : vector<2x1xf32> to vector<2x8xf32>
    %12 = arith.subf %8, %11 : vector<2x8xf32>
    %13 = math.exp %12 : vector<2x8xf32>
    %cst_8 = arith.constant dense<0.000000e+00> : vector<2xf32>
    %14 = vector.multi_reduction <add>, %13, %cst_8 [1] : vector<2x8xf32> to vector<2xf32>
    %15 = vector.shape_cast %14 : vector<2xf32> to vector<2x1xf32>
    %16 = vector.broadcast %15 : vector<2x1xf32> to vector<2x8xf32>
    %17 = arith.divf %13, %16 : vector<2x8xf32>
    %c0_9 = arith.constant 0 : index
    %c0_10 = arith.constant 0 : index
    %18 = vector.load %arg4[%c0_9, %c0_10] : memref<2x8xf32, #tpu.memory_space<vmem>>, vector<2x8xf32>
    tpu.vector_store %arg4[%c0_9, %c0_10], %17 {strides = array<i32>} : memref<2x8xf32, #tpu.memory_space<vmem>>, vector<2x8xf32>,
    return
  }
  func.func @transform_0(%arg0: i32) -> (i32, i32) {
    %c0_i32 = arith.constant 0 : i32
    %c0_i32_0 = arith.constant 0 : i32
    %c0_i32_1 = arith.constant 0 : i32
    return %c0_i32, %c0_i32_0 : i32, i32
  }
  func.func @transform_1(%arg0: i32) -> (i32, i32, i32) {
    %c0_i32 = arith.constant 0 : i32
    %c0_i32_0 = arith.constant 0 : i32
    %c0_i32_1 = arith.constant 0 : i32
    %c0_i32_2 = arith.constant 0 : i32
    return %c0_i32, %c0_i32_0, %c0_i32_1 : i32, i32, i32
  }
  func.func @transform_2(%arg0: i32) -> (i32, i32) {
    %c0_i32 = arith.constant 0 : i32
    %c0_i32_0 = arith.constant 0 : i32
    %c0_i32_1 = arith.constant 0 : i32
    return %c0_i32, %c0_i32_0 : i32, i32
  }
  func.func @transform_3(%arg0: i32) -> (i32, i32) {
    %c0_i32 = arith.constant 0 : i32
    %c0_i32_0 = arith.constant 0 : i32
    %c0_i32_1 = arith.constant 0 : i32
    return %c0_i32, %c0_i32_0 : i32, i32
  }
}

</mosaic_0001>

<bundles_post_ra>
// kernel: tpu_custom_call.1
= control target key start
LH: loop header
LB: loop body
LE: loop exit
PB: predicated region body
PF: predicated region fallthrough
CT: control target
= control target key end

     0   :  { %8 = vsyncpa [#allocation3], 0  ;;  %s536_s0 = inlined_call_operand.hbm [shape: f32[2,64], index: 0, kind: input, shape index: {}]   ;;  %s537_s1 = inlined_call_operand.hbm [shape: f32[8,2,64], index: 1, kind: input, shape index: {}]   ;;  %s538_s2 = inlined_call_operand.hbm [shape: f32[64,64], index: 2, kind: input, shape index: {}]   ;;  %s539_s3 = inlined_call_operand.hbm [shape: f32[2,8], index: 3, kind: output, shape index: {}]  }
   0x1   :  { %9 = vsyncpa [#allocation6], 0 }
   0x2   :  { %10 = vsyncpa [#allocation4], 0  ;;  %s446_s12 = smov [#allocation5]   ;;  %s352_s16 = scalar_lea.hbm %s537_s1, 256 }
   0x3   :  { %s26_s13 = sshll.u32 %s446_s12, 4  ;;  %p353_p0 = scmp.ne.s32.totalorder %s537_s1, %s352_s16  ;;  %s27_s13 = int_to_ptr.vmem [resolvable:$true] %s26_s13 }
   0x4   :  { %p356_p1 = scmp.lt.u32.totalorder %s352_s16, %s537_s1 }
   0x6   :  { %p358_p2 = pnand %p356_p1, %p353_p0 }
   0x8   :  { %361 = shalt.err (!%p358_p2)
}
   0x9   :  { %s362_s21 = scalar_lea.vmem %s27_s13, 256  ;;  %p367_p4 = scmp.lt.s32.totalorder %s27_s13, %s27_s13 }
   0xa   :  { %p363_p3 = scmp.ne.s32.totalorder %s27_s13, %s362_s21  ;;  %p368_p5 = scmp.lt.s32.totalorder %s362_s21, %s362_s21 }
   0xc   :  { %p369_p6 = por %p368_p5, %p367_p4 }
   0xe   :  { %p370_p7 = pnand %p369_p6, %p363_p3 }
  0x10   :  { %373 = shalt.err (!%p370_p7)
}
  0x11   :  { %s447_s22 = smov 32   ;;  %s448_s23 = smov 2  }
  0x12   :  { %32 = dma.hbm_to_vmem [thread:$0]  %s537_s1, 256, %s27_s13, [#allocation6], %s447_s22, %s447_s22, %s448_s23  }
  0x13   :  { %s449_s26 = smov [#allocation2]   ;;  %s450_s28 = smov [#allocation7]  }
  0x14   :  { %s17_s27 = sshll.u32 %s449_s26, 4  ;;  %s38_s29 = sshll.u32 %s450_s28, 4  ;;  %s18_s27 = int_to_ptr.vmem [resolvable:$true] %s17_s27  ;;  %s39_s29 = int_to_ptr.vmem [resolvable:$true] %s38_s29 }
  0x15   :  { %s374_s5 = scalar_lea.hbm %s536_s0, 32 }
  0x16   :  { %p375_p8 = scmp.ne.s32.totalorder %s536_s0, %s374_s5  ;;  %p378_p9 = scmp.lt.u32.totalorder %s374_s5, %s536_s0 }
  0x18   :  { %p380_p10 = pnand %p378_p9, %p375_p8 }
  0x1a   :  { %383 = shalt.err (!%p380_p10)
}
  0x1b   :  { %s384_s1 = scalar_lea.vmem %s18_s27, 32  ;;  %p389_p12 = scmp.lt.s32.totalorder %s18_s27, %s18_s27 }
  0x1c   :  { %p385_p11 = scmp.ne.s32.totalorder %s18_s27, %s384_s1  ;;  %p390_p13 = scmp.lt.s32.totalorder %s384_s1, %s384_s1 }
  0x1e   :  { %p391_p0 = por %p390_p13, %p389_p12 }
  0x20   :  { %p392_p1 = pnand %p391_p0, %p385_p11 }
  0x22   :  { %395 = shalt.err (!%p392_p1)
}
  0x23   :  { %20 = dma.hbm_to_vmem [thread:$0]  %s536_s0, 32, %s18_s27, [#allocation3]  }
  0x24   :  { %s396_s14 = scalar_lea.hbm %s538_s2, 1024 }
  0x25   :  { %p397_p2 = scmp.ne.s32.totalorder %s538_s2, %s396_s14  ;;  %p400_p3 = scmp.lt.u32.totalorder %s396_s14, %s538_s2 }
  0x27   :  { %p402_p4 = pnand %p400_p3, %p397_p2 }
  0x29   :  { %405 = shalt.err (!%p402_p4)
}
  0x2a   :  { %s406_s19 = scalar_lea.vmem %s39_s29, 1024  ;;  %p411_p6 = scmp.lt.s32.totalorder %s39_s29, %s39_s29 }
  0x2b   :  { %p407_p5 = scmp.ne.s32.totalorder %s39_s29, %s406_s19  ;;  %p412_p7 = scmp.lt.s32.totalorder %s406_s19, %s406_s19 }
  0x2d   :  { %p413_p8 = por %p412_p7, %p411_p6 }
  0x2f   :  { %p414_p9 = pnand %p413_p8, %p407_p5 }
  0x31   :  { %417 = shalt.err (!%p414_p9)
}
  0x32   :  { %s451_s0 = smov 128   ;;  %s452_s20 = smov 8  }
  0x33   :  { %44 = dma.hbm_to_vmem [thread:$0]  %s538_s2, 1024, %s39_s29, [#allocation6], %s451_s0, %s451_s0, %s452_s20  }
  0x34   :  { %440 = dma.done.wait [#allocation3], 32  }
  0x35   :  { %441 = vsyncadd [#allocation3], 4294967264 }
  0x36   :  { %442 = dma.done.wait [#allocation6], 1280  }
  0x37   :  { %443 = vsyncadd [#allocation6], 4294966016  ;;  %v453_v0 = vmov 0.0|0.0   ;;  %vm454_vm0 = vmmov 0   ;;  %v455_v1 = vmov 0.0   ;;  %v55_v2 = vld [vmem:[#allocation7] sm:$0xff]  ;;  %v186_v41 = vlaneseq }
  0x38   :  { %325 = vmatprep.subr.bf16.mxu0 %v453_v0  ;;  %322 = vmatprep.mubr.msk.f32.mxu0 %vm454_vm0, %v455_v1  ;;  %v56_v3 = vld [vmem:[#allocation7 + $0x8] sm:$0xff]  ;;  %v57_v4 = vld [vmem:[#allocation7 + $0x10] sm:$0xff]  ;;  %v58_v6 = vld [vmem:[#allocation7 + $0x18] sm:$0xff]  ;;  %vm63_vm1 = vcmask 523264   ;;  %vm153_vm2 = vcmask 517120   ;;  %vm220_vm3 = vcmask 1041409  }
  0x39   :  { %v326_v5 = vpack.c.bf16 %v56_v3, %v55_v2  ;;  %v329_v7 = vpack.c.bf16 %v58_v6, %v57_v4  ;;  %v59_v8 = vld [vmem:[#allocation7 + $0x20] sm:$0xff]  ;;  %v60_v9 = vld [vmem:[#allocation7 + $0x28] sm:$0xff]  ;;  %v61_v11 = vld [vmem:[#allocation7 + $0x30] sm:$0xff]  ;;  %v187_v42 = vand.u32 127, %v186_v41  ;;  %v189_v43 = vshrl.u32 %v186_v41, 7  ;;  %s456_s2 = smov [#allocation8]  }
  0x3a   :  { %v332_v10 = vpack.c.bf16 %v60_v9, %v59_v8  ;;  %v62_v12 = vld [vmem:[#allocation7 + $0x38] sm:$0xff]  ;;  %v54_v14 = vld [vmem:[#allocation2] sm:$0x3]  ;;  %v139_v15 = vld [vmem:[#allocation5 + $0x4] sm:$0x3]  ;;  %vm222_vm4 = vcmask 1042434  }
  0x3b   :  { %327 = vmatpush3.bf16.msra.mxu0 %v326_v5  ;;  %v335_v13 = vpack.c.bf16 %v62_v12, %v61_v11  ;;  %v137_v16 = vld [vmem:[#allocation5] sm:$0x3]  ;;  %v140_v18 = vld [vmem:[#allocation5 + $0x6] sm:$0x3]  ;;  %v138_v19 = vld [vmem:[#allocation5 + $0x2] sm:$0x3]  ;;  %v190_v46 = vsub.s32 %v187_v42, %v189_v43 }
  0x3c   :  { %328 = vmatprep.subr.bf16.mxu0 %v453_v0  ;;  %v142_v27 = vld [vmem:[#allocation5 + $0xa] sm:$0x3]  ;;  %v141_v28 = vld [vmem:[#allocation5 + $0x8] sm:$0x3]  ;;  %v144_v33 = vld [vmem:[#allocation5 + $0xe] sm:$0x3] }
  0x3d   :  { %v143_v34 = vld [vmem:[#allocation5 + $0xc] sm:$0x3]  ;;  %vm224_vm5 = vcmask 1043459   ;;  %vm226_vm6 = vcmask 1044484   ;;  %vm228_vm7 = vcmask 1045509   ;;  %vm230_vm8 = vcmask 1046534  }
  0x3e   :  { %vm232_vm9 = vcmask 1047559   ;;  %vm267_vm10 = vcmask 58368   ;;  %s286_s23 = sshll.u32 %s456_s2, 4  ;;  %s287_s23 = int_to_ptr.vmem [resolvable:$true] %s286_s23 }
  0x3f   :  { %330 = vmatpush3.bf16.msra.mxu0 %v329_v7  ;;  %s418_s24 = scalar_lea.vmem %s287_s23, 32  ;;  %p423_p11 = scmp.lt.s32.totalorder %s287_s23, %s287_s23 }
  0x40   :  { %331 = vmatprep.subr.bf16.mxu0 %v453_v0  ;;  %p419_p10 = scmp.ne.s32.totalorder %s287_s23, %s418_s24  ;;  %p424_p12 = scmp.lt.s32.totalorder %s418_s24, %s418_s24 }
  0x42   :  { %p425_p13 = por %p424_p12, %p423_p11 }
  0x43   :  { %333 = vmatpush3.bf16.msra.mxu0 %v332_v10 }
  0x44   :  { %334 = vmatprep.subr.bf16.mxu0 %v453_v0  ;;  %p426_p0 = pnand %p425_p13, %p419_p10 }
  0x47   :  { %336 = vmatpush3.bf16.msra.mxu0 %v335_v13 }
  0x4a   :  { %323 = vmatmul.mubr.msk.f32.vlgmr.msra.gmra.mrb[0].mxu0 %vm63_vm1, %v54_v14 }
 0x11d   :  { %v133_v17 = vpop.f32.mrb[0].mxu0 }
 0x11e   :  { %v324_v20 = vpop.f32.mrb[1].mxu0  ;;  %v147_v21 = vmul.f32 %v139_v15, %v133_v17  ;;  %v145_v22 = vmul.f32 %v137_v16, %v133_v17  ;;  %v148_v25 = vmul.f32 %v140_v18, %v133_v17  ;;  %v146_v26 = vmul.f32 %v138_v19, %v133_v17 }
 0x11f   :  { %v150_v31 = vmul.f32 %v142_v27, %v133_v17  ;;  %v149_v32 = vmul.f32 %v141_v28, %v133_v17  ;;  %v152_v37 = vmul.f32 %v144_v33, %v133_v17  ;;  %v151_v38 = vmul.f32 %v143_v34, %v133_v17 }
 0x120   :  { %v160_v23 = vsel %vm153_vm2, %v147_v21, 0.0  ;;  %v154_v24 = vsel %vm153_vm2, %v145_v22, 0.0  ;;  %v163_v29 = vsel %vm153_vm2, %v148_v25, 0.0  ;;  %v157_v30 = vsel %vm153_vm2, %v146_v26, 0.0 }
 0x121   :  { %161 = vadd.xlane.f32.xlu1 %v160_v23  ;;  %155 = vadd.xlane.f32.xlu0 %v154_v24  ;;  %v169_v35 = vsel %vm153_vm2, %v150_v31, 0.0  ;;  %v166_v36 = vsel %vm153_vm2, %v149_v32, 0.0  ;;  %v175_v39 = vsel %vm153_vm2, %v152_v37, 0.0  ;;  %v172_v40 = vsel %vm153_vm2, %v151_v38, 0.0 }
 0x125   :  { %164 = vadd.xlane.f32.xlu1 %v163_v29  ;;  %158 = vadd.xlane.f32.xlu0 %v157_v30 }
 0x129   :  { %170 = vadd.xlane.f32.xlu1 %v169_v35  ;;  %167 = vadd.xlane.f32.xlu0 %v166_v36 }
 0x12d   :  { %176 = vadd.xlane.f32.xlu1 %v175_v39  ;;  %173 = vadd.xlane.f32.xlu0 %v172_v40 }
 0x1ae   :  { %v162_v44 = vpop.xlane.xlu1 %161  ;;  %v156_v45 = vpop.xlane.xlu0 %155 }
 0x1af   :  { %v191_v49 = vrot.slane %v156_v45, %v190_v46  ;;  %v199_v51 = vrot.slane %v162_v44, %v190_v46 }
 0x1b2   :  { %v165_v47 = vpop.xlane.xlu1 %164  ;;  %v159_v48 = vpop.xlane.xlu0 %158 }
 0x1b3   :  { %v195_v50 = vrot.slane %v159_v48, %v190_v46  ;;  %v203_v52 = vrot.slane %v165_v47, %v190_v46 }
 0x1b5   :  { %v221_v53 = vsel %vm220_vm3, %v195_v50, %v191_v49 }
 0x1b6   :  { %v223_v54 = vsel %vm222_vm4, %v199_v51, %v221_v53  ;;  %v171_v55 = vpop.xlane.xlu1 %170  ;;  %v168_v56 = vpop.xlane.xlu0 %167 }
 0x1b7   :  { %v225_v57 = vsel %vm224_vm5, %v203_v52, %v223_v54  ;;  %v207_v58 = vrot.slane %v168_v56, %v190_v46  ;;  %v211_v59 = vrot.slane %v171_v55, %v190_v46 }
 0x1b9   :  { %v227_v60 = vsel %vm226_vm6, %v207_v58, %v225_v57 }
 0x1ba   :  { %v177_v61 = vpop.xlane.xlu1 %176  ;;  %v174_v62 = vpop.xlane.xlu0 %173  ;;  %v229_v1 = vsel %vm228_vm7, %v211_v59, %v227_v60 }
 0x1bb   :  { %v219_v63 = vrot.slane %v177_v61, %v190_v46  ;;  %v215_v0 = vrot.slane %v174_v62, %v190_v46 }
 0x1bd   :  { %v231_v2 = vsel %vm230_vm8, %v215_v0, %v229_v1 }
 0x1be   :  { %v233_v3 = vsel %vm232_vm9, %v219_v63, %v231_v2 }
 0x1bf   :  { %235 = vxpose.xlu0.b32.start.end [1/1] (short) (narrow) %v233_v3, 8 }
 0x23f   :  { %v251_v4 = vpop.trf.xlu0 }
 0x240   :  { %v268_v5 = vsel %vm267_vm10, %v251_v4, -inf }
 0x241   :  { %269 = vmax.xlane.f32.xlu1 %v268_v5 }
 0x2ce   :  { %v270_v6 = vpop.xlane.xlu1 %269 }
 0x2cf   :  { %v271_v7 = vsub.f32 %v251_v4, %v270_v6 }
 0x2d1   :  { %v272_v8 = vmul.f32 1.442695, %v271_v7 }
 0x2d3   :  { %348 = vpow2.f32 %v272_v8 }
 0x2dd   :  { %v349_v9 = vpop.eup %348 }
 0x2de   :  { %v274_v10 = vsel %vm267_vm10, %v349_v9, 0.0 }
 0x2df   :  { %275 = vadd.xlane.f32.xlu1 %v274_v10 }
 0x36c   :  { %v276_v11 = vpop.xlane.xlu1 %275 }
 0x36d   :  { %350 = vrcp.f32 %v276_v11 }
 0x377   :  { %v351_v12 = vpop.eup %350 }
 0x378   :  { %v278_v13 = vmul.f32 %v351_v12, %v349_v9 }
 0x37a   :  { %279 = vst.msk [vmem:[#allocation8] sm:$0x3] %vm267_vm10, %v278_v13 }
 0x37b   :  { %429 = shalt.err (!%p426_p0)
}
 0x37c   :  { %s430_s27 = scalar_lea.hbm %s539_s3, 32 }
 0x37d   :  { %p431_p1 = scmp.ne.s32.totalorder %s539_s3, %s430_s27  ;;  %p434_p2 = scmp.lt.u32.totalorder %s430_s27, %s539_s3 }
 0x37f   :  { %p436_p3 = pnand %p434_p2, %p431_p1 }
 0x381   :  { %439 = shalt.err (!%p436_p3)
}
 0x382   :  { %289 = dma.vmem_to_hbm [thread:$0]  %s287_s23, 32, %s539_s3, [#allocation4]  }
 0x383   :  { %444 = dma.done.wait [#allocation4], 32  }
 0x384   :  { %445 = vsyncadd [#allocation4], 4294967264 }
 0x385   :  { %293 = vsyncpa [#allocation3], 1 }
 0x386   :  { %294 = vsyncpa [#allocation6], 1 }
 0x387   :  { %295 = vsyncpa [#allocation4], 1 }

</bundles_post_ra>
